<compile_context>
chip_gen: v7x
topology: tpu7x:2x2x1
jax: 0.10.0
libtpu: 0.0.40
codegen_flags: <defaults>
</compile_context>

<pallas_src>
import functools

import numpy as np
import jax
import jax.numpy as jnp
from jax.experimental import pallas as pl
from jax.experimental.pallas import tpu as pltpu


_VMEM_BLOCK_BUDGET = 16 * 1024 * 1024       # conservative per-call block budget
_VMEM_LIMIT_BYTES = 48 * 1024 * 1024        # < 64 MiB physical VMEM on v7x
_FUSED_WEIGHT_BYTES_MAX = 2 * 1024 * 1024   # use the fused (Kronecker) kernel below this


def _pad(v, m):
    return ((int(v) + m - 1) // m) * m


def _choose_tb(nc, per_slab_bytes, fixed_bytes, budget=_VMEM_BLOCK_BUDGET):
    """Pick the number of (N*C) slabs per block under a conservative VMEM budget."""
    avail = max(budget - fixed_bytes, per_slab_bytes)
    tb = int(avail // max(int(per_slab_bytes), 1))
    if tb >= nc:
        return int(nc)
    # Keep the second-to-last block dim sublane friendly (multiple of 8).
    return int(min(nc, max(8, (tb // 8) * 8)))


# ----------------------------------------------------------------------------
# Static interpolation weight matrices (NumPy, no device data touched).
# ----------------------------------------------------------------------------
def _interp_weight_matrix(x_start, x_size_local, x_global,
                          y_start, y_size_local, y_global,
                          scale_factor, mode, align_corners):
    """Return W of shape (y_size_local, x_size_local) s.t. y_local = W @ x_local."""
    g_out = np.arange(y_start, y_start + y_size_local, dtype=np.float64)

    if scale_factor is not None:
        # NOTE: matches the previous (accepted) behavior; PyTorch's exact
        # convention depends on recompute_scale_factor.
        scale = 1.0 / float(scale_factor)
    else:
        scale = float(x_global) / float(y_global)

    W = np.zeros((y_size_local, x_size_local), dtype=np.float64)

    if mode == 'nearest':
        src = np.floor(g_out * scale).astype(np.int64)
        src = np.clip(src, 0, x_global - 1)
        src_local = src - x_start
        assert np.all((src_local >= 0) & (src_local < x_size_local)), \
            "source subtensor does not cover the required input range"
        W[np.arange(y_size_local), src_local] = 1.0
    elif mode in ('linear', 'bilinear', 'trilinear'):
        if align_corners:
            scale_ac = (x_global - 1) / max(y_global - 1, 1)
            src = g_out * scale_ac
        else:
            src = (g_out + 0.5) * scale - 0.5
            src = np.maximum(src, 0.0)
        i0 = np.clip(np.floor(src).astype(np.int64), 0, x_global - 1)
        i1 = np.minimum(i0 + 1, x_global - 1)
        w1 = (src - i0).astype(np.float64)
        w0 = 1.0 - w1
        i0_l, i1_l = i0 - x_start, i1 - x_start
        assert np.all((i0_l >= 0) & (i1_l < x_size_local)), \
            "source subtensor does not cover the required input range"
        rows = np.arange(y_size_local)
        np.add.at(W, (rows, i0_l), w0)
        np.add.at(W, (rows, i1_l), w1)
    else:
        # TODO(synk): 'cubic' / 'area' modes not implemented.
        raise NotImplementedError(f"mode={mode}")
    return W


# ----------------------------------------------------------------------------
# Pallas kernels
# ----------------------------------------------------------------------------
def _fused_kernel(kt_ref, x_ref, o_ref, *, compute_dtype):
    # One big lane-dense matmul: (TB, Hx*Wx) @ (Hx*Wx, Hy*Wy) -> (TB, Hy*Wy)
    x = x_ref[...].astype(compute_dtype)
    y = jnp.dot(x, kt_ref[...], preferred_element_type=jnp.float32)
    o_ref[...] = y.astype(o_ref.dtype)


def _separable_kernel(whb_ref, wwt_ref, x_ref, o_ref, *, w_first, compute_dtype):
    # x block: (TB, Hx, Wx);  whb: (TB, Hy, Hx) (broadcast W_h);  wwt: (Wx, Wy)
    x = x_ref[...].astype(compute_dtype)
    tb, hx, wx = x.shape
    hy = whb_ref.shape[1]
    wy = wwt_ref.shape[1]
    if w_first:
        # W pass as a single reshaped big matmul, then batched H pass.
        t = jnp.dot(x.reshape(tb * hx, wx), wwt_ref[...],
                    preferred_element_type=jnp.float32)            # (TB*Hx, Wy)
        t = t.reshape(tb, hx, wy).astype(compute_dtype)
        y = jnp.einsum('bph,bhq->bpq', whb_ref[...], t,
                       preferred_element_type=jnp.float32)         # (TB, Hy, Wy)
    else:
        # Batched H pass first, then W pass as a single reshaped big matmul.
        t = jnp.einsum('bph,bhw->bpw', whb_ref[...], x,
                       preferred_element_type=jnp.float32)         # (TB, Hy, Wx)
        t = t.astype(compute_dtype)
        y = jnp.dot(t.reshape(tb * hy, wx), wwt_ref[...],
                    preferred_element_type=jnp.float32)            # (TB*Hy, Wy)
        y = y.reshape(tb, hy, wy)
    o_ref[...] = y.astype(o_ref.dtype)


# ----------------------------------------------------------------------------
# Wrapper
# ----------------------------------------------------------------------------
def interpolate_pallas(x,
                       x_local_start, x_local_stop, x_global_shape,
                       y_local_start, y_local_stop, y_global_shape,
                       scale_factor=None, mode='nearest', align_corners=False,
                       impl=None):
    assert impl in (None, 'fused', 'separable')
    x_local_start = tuple(int(v) for v in x_local_start)
    x_local_stop = tuple(int(v) for v in x_local_stop)
    x_global_shape = tuple(int(v) for v in x_global_shape)
    y_local_start = tuple(int(v) for v in y_local_start)
    y_local_stop = tuple(int(v) for v in y_local_stop)
    y_global_shape = tuple(int(v) for v in y_global_shape)

    x_local_shape = tuple(b - a for a, b in zip(x_local_start, x_local_stop))
    y_local_shape = tuple(b - a for a, b in zip(y_local_start, y_local_stop))
    assert tuple(x.shape) == x_local_shape, (x.shape, x_local_shape)
    assert len(x_local_shape) == 4, "this kernel handles 4-D (N, C, H, W) tensors"

    N, C, Hx, Wx = x_local_shape
    Ny, Cy, Hy, Wy = y_local_shape
    # Batch / channel dims are never interpolated (PyTorch semantics).
    assert (N, C) == (Ny, Cy)
    assert x_local_start[:2] == y_local_start[:2]

    if scale_factor is None:
        sf_h = sf_w = None
    elif np.isscalar(scale_factor):
        sf_h = sf_w = scale_factor
    else:
        sf_h, sf_w = scale_factor

    W_h = _interp_weight_matrix(x_local_start[2], Hx, x_global_shape[2],
                                y_local_start[2], Hy, y_global_shape[2],
                                sf_h, mode, align_corners)            # (Hy, Hx)
    W_w = _interp_weight_matrix(x_local_start[3], Wx, x_global_shape[3],
                                y_local_start[3], Wy, y_global_shape[3],
                                sf_w, mode, align_corners)            # (Wy, Wx)

    # MXU operand dtype: keep bf16/f32 inputs in their native dtype for
    # 'nearest' (one-hot weights are exact); use f32 weights/operands for
    # 'linear' to preserve accuracy.  Accumulation is always f32.
    mxu_native = (np.dtype(jnp.bfloat16), np.dtype(jnp.float32))
    if mode == 'nearest' and np.dtype(x.dtype) in mxu_native:
        compute_dtype = np.dtype(x.dtype)
    else:
        compute_dtype = np.dtype(jnp.float32)

    NC = N * C
    HxWx, HyWy = Hx * Wx, Hy * Wy
    elem = np.dtype(x.dtype).itemsize
    c_elem = np.dtype(compute_dtype).itemsize

    kron_bytes = _pad(HxWx, 8) * _pad(HyWy, 128) * c_elem
    if impl is None:
        use_fused = (kron_bytes <= _FUSED_WEIGHT_BYTES_MAX) and (Wy < 128)
    else:
        use_fused = (impl == 'fused')

    semantics = pltpu.CompilerParams(
        dimension_semantics=("parallel",),
        vmem_limit_bytes=_VMEM_LIMIT_BYTES)

    if use_fused:
        # --------------------------- fused (Kronecker) path -----------------
        K = np.kron(W_h, W_w)                                   # (HyWy, HxWx)
        Kt = jnp.asarray(K.T, dtype=compute_dtype)              # (HxWx, HyWy)
        x2 = x.reshape(NC, HxWx)

        per_slab = (2 * _pad(HxWx, 128) * elem
                    + 2 * _pad(HyWy, 128) * elem
                    + _pad(HyWy, 128) * 4)                      # f32 accumulator row
        fixed = 2 * _pad(HxWx, 8) * _pad(HyWy, 128) * c_elem
        # NOTE(perf): the constant weight block could be single-buffered via
        # pipeline_mode=pl.Buffered(1); omitted for wide compatibility.
        TB = _choose_tb(NC, per_slab, fixed)

        kernel = functools.partial(_fused_kernel, compute_dtype=compute_dtype)
        out2 = pl.pallas_call(
            kernel,
            out_shape=jax.ShapeDtypeStruct((NC, HyWy), x.dtype),
            grid=(pl.cdiv(NC, TB),),
            in_specs=[
                pl.BlockSpec((HxWx, HyWy), lambda b: (0, 0)),   # K^T (constant)
                pl.BlockSpec((TB, HxWx), lambda b: (b, 0)),     # x slabs
            ],
            out_specs=pl.BlockSpec((TB, HyWy), lambda b: (b, 0)),
            compiler_params=semantics,
            cost_estimate=pl.CostEstimate(
                flops=int(2 * NC * HxWx * HyWy),
                transcendentals=0,
                bytes_accessed=int(NC * HxWx * elem + NC * HyWy * elem
                                   + HxWx * HyWy * c_elem)),
        )(Kt, x2)
        return out2.reshape(N, C, Hy, Wy)

    # ------------------------------ separable path ---------------------------
    # Static matmul-order selection (per-slab FLOPs / intermediate size).
    flops_w_first = Hx * Wx * Wy + Hy * Hx * Wy
    flops_h_first = Hy * Hx * Wx + Hy * Wx * Wy
    w_first = flops_w_first < flops_h_first

    inter_bytes = (_pad(Hx, 8) * _pad(Wy, 128) if w_first
                   else _pad(Hy, 8) * _pad(Wx, 128)) * 4
    per_slab = (2 * _pad(Hx, 8) * _pad(Wx, 128) * elem          # input block (2x buffered)
                + 2 * _pad(Hy, 8) * _pad(Wy, 128) * elem        # output block (2x buffered)
                + 2 * _pad(Hy, 8) * _pad(Hx, 128) * c_elem      # broadcast W_h slab
                + inter_bytes)                                   # f32 intermediate
    fixed = 2 * _pad(Wx, 8) * _pad(Wy, 128) * c_elem
    TB = _choose_tb(NC, per_slab, fixed)

    W_h_arr = jnp.asarray(W_h, dtype=compute_dtype)             # (Hy, Hx)
    # H-pass is a batched matmul, so W_h is broadcast over the block's batch
    # dimension host-side; its bytes are accounted for in the TB budget.
    whb = jnp.broadcast_to(W_h_arr[None, :, :], (TB, Hy, Hx))
    wwt = jnp.asarray(W_w.T, dtype=compute_dtype)               # (Wx, Wy)

    x3 = x.reshape(NC, Hx, Wx)
    kernel = functools.partial(_separable_kernel,
                               w_first=w_first, compute_dtype=compute_dtype)
    flops = 2 * NC * (flops_w_first if w_first else flops_h_first)
    out3 = pl.pallas_call(
        kernel,
        out_shape=jax.ShapeDtypeStruct((NC, Hy, Wy), x.dtype),
        grid=(pl.cdiv(NC, TB),),
        in_specs=[
            pl.BlockSpec((TB, Hy, Hx), lambda b: (0, 0, 0)),    # broadcast W_h (constant)
            pl.BlockSpec((Wx, Wy), lambda b: (0, 0)),           # W_w^T (constant)
            pl.BlockSpec((TB, Hx, Wx), lambda b: (b, 0, 0)),    # x slabs
        ],
        out_specs=pl.BlockSpec((TB, Hy, Wy), lambda b: (b, 0, 0)),
        compiler_params=semantics,
        cost_estimate=pl.CostEstimate(
            flops=int(flops),
            transcendentals=0,
            bytes_accessed=int(NC * (Hx * Wx + Hy * Wy) * elem
                               + TB * Hy * Hx * c_elem + Wx * Wy * c_elem)),
    )(whb, wwt, x3)
    return out3.reshape(N, C, Hy, Wy)


# ----------------------------------------------------------------------------
# Pure NumPy references (validation only)
# ----------------------------------------------------------------------------
def _ref_nearest(x, x_start, x_gshape, y_start, y_lshape, y_gshape, scale_factor):
    def src_idx(dim, out_size_local):
        g_out = np.arange(y_start[dim], y_start[dim] + out_size_local)
        scale = (1.0 / scale_factor if scale_factor is not None
                 else x_gshape[dim] / y_gshape[dim])
        src = np.clip(np.floor(g_out * scale).astype(np.int64), 0, x_gshape[dim] - 1)
        return src - x_start[dim]

    hi = src_idx(2, y_lshape[2])
    wi = src_idx(3, y_lshape[3])
    xn = np.asarray(x)
    return xn[:, :, hi, :][:, :, :, wi]


def _ref_interp(x, x_ls, x_gs, y_ls, y_lshape, y_gs, scale_factor, mode, align_corners):
    if scale_factor is None or np.isscalar(scale_factor):
        sf_h = sf_w = scale_factor
    else:
        sf_h, sf_w = scale_factor
    Hx, Wx = x.shape[2], x.shape[3]
    Hy, Wy = y_lshape[2], y_lshape[3]
    W_h = _interp_weight_matrix(x_ls[2], Hx, x_gs[2], y_ls[2], Hy, y_gs[2],
                                sf_h, mode, align_corners)
    W_w = _interp_weight_matrix(x_ls[3], Wx, x_gs[3], y_ls[3], Wy, y_gs[3],
                                sf_w, mode, align_corners)
    xf = np.asarray(x, dtype=np.float64)
    return np.einsum('ph,nchw,qw->ncpq', W_h, xf, W_w)


# ----------------------------------------------------------------------------
if __name__ == "__main__":
    key = jax.random.PRNGKey(0)

    # ---- Case 1: 8x8 -> 16x16 upsample; local output window is rows 4..12 ----
    x_gs = (2, 4, 8, 8)
    y_gs = (2, 4, 16, 16)
    x_ls, x_lp = (0, 0, 0, 0), x_gs
    y_ls, y_lp = (0, 0, 4, 0), (2, 4, 12, 16)
    y_lshape = tuple(b - a for a, b in zip(y_ls, y_lp))

    x = jax.random.normal(key, x_gs, dtype=jnp.float32)

    # 'nearest' (module default) — fused (Kronecker) path.
    y_n = jax.block_until_ready(interpolate_pallas(
        x, x_ls, x_lp, x_gs, y_ls, y_lp, y_gs, mode='nearest'))
    assert y_n.shape == y_lshape
    np.testing.assert_allclose(
        np.asarray(y_n),
        _ref_nearest(x, x_ls, x_gs, y_ls, y_lshape, y_gs, None),
        rtol=1e-5, atol=1e-5)

    # 'linear' (bilinear), align_corners=False — fused path.
    y_l = jax.block_until_ready(interpolate_pallas(
        x, x_ls, x_lp, x_gs, y_ls, y_lp, y_gs, mode='linear', align_corners=False))
    np.testing.assert_allclose(
        np.asarray(y_l),
        _ref_interp(x, x_ls, x_gs, y_ls, y_lshape, y_gs, None, 'linear', False),
        rtol=1e-5, atol=1e-5)

    # Same problem forced through the general separable kernel (H-first order).
    y_l_sep = jax.block_until_ready(interpolate_pallas(
        x, x_ls, x_lp, x_gs, y_ls, y_lp, y_gs, mode='linear', impl='separable'))
    np.testing.assert_allclose(np.asarray(y_l_sep), np.asarray(y_l),
                               rtol=1e-5, atol=1e-5)

    # ---- Case 2: asymmetric scaling (H up, W unchanged) -> W-first order ----
    y_gs2 = (2, 4, 16, 8)
    y_ls2, y_lp2 = (0, 0, 0, 0), y_gs2
    y2 = jax.block_until_ready(interpolate_pallas(
        x, x_ls, x_lp, x_gs, y_ls2, y_lp2, y_gs2, mode='linear', impl='separable'))
    np.testing.assert_allclose(
        np.asarray(y2),
        _ref_interp(x, x_ls, x_gs, y_ls2, y_gs2, y_gs2, None, 'linear', False),
        rtol=1e-5, atol=1e-5)

    # ---- Case 3: bf16 input, 'nearest' (one-hot weights are exact in bf16) --
    xb = x.astype(jnp.bfloat16)
    y_b = jax.block_until_ready(interpolate_pallas(
        xb, x_ls, x_lp, x_gs, y_ls, y_lp, y_gs, mode='nearest'))
    ref_b = _ref_nearest(xb, x_ls, x_gs, y_ls, y_lshape, y_gs, None)
    np.testing.assert_array_equal(np.asarray(y_b, dtype=np.float32),
                                  np.asarray(ref_b, dtype=np.float32))

    print("KERNEL_OK")
</pallas_src>

<mosaic_0001>
module attributes {stable_mosaic.version = 11 : i64} {
  func.func @_fused_kernel(%arg0: i32, %arg1: memref<64x128xf32, #tpu.memory_space<vmem>>, %arg2: memref<8x64xf32, #tpu.memory_space<vmem>>, %arg3: memref<8x128xf32, #tpu.memory_space<vmem>>) attributes {dimension_semantics = [#tpu.dimension_semantics<parallel>], iteration_bounds = array<i64: 1>, scalar_prefetch = 0 : i64, scratch_operands = 0 : i64, tpu.core_type = #tpu.core_type<tc>, window_params = [{pipeline_mode = #tpu.pipeline_mode<synchronous>, transform_indices = @transform_0, window_bounds = array<i64: 64, 128>}, {transform_indices = @transform_1, window_bounds = array<i64: 8, 64>}, {transform_indices = @transform_2, window_bounds = array<i64: 8, 128>}]} {
    %c0 = arith.constant 0 : index
    %c0_0 = arith.constant 0 : index
    %0 = vector.load %arg2[%c0, %c0_0] : memref<8x64xf32, #tpu.memory_space<vmem>>, vector<8x64xf32>
    %c0_1 = arith.constant 0 : index
    %c0_2 = arith.constant 0 : index
    %1 = vector.load %arg1[%c0_1, %c0_2] : memref<64x128xf32, #tpu.memory_space<vmem>>, vector<64x128xf32>
    %cst = arith.constant dense<0.000000e+00> : vector<8x128xf32>
    %2 = tpu.matmul %0, %1, %cst {dimension_numbers = #tpu.dot_dimension_numbers<[1], [0], [0], [1], [0, 0, 1, 1], [], []>} : vector<8x64xf32>, vector<64x128xf32>, vector<8x128xf32> -> vector<8x128xf32>
    %c0_3 = arith.constant 0 : index
    %c0_4 = arith.constant 0 : index
    %3 = vector.load %arg3[%c0_3, %c0_4] : memref<8x128xf32, #tpu.memory_space<vmem>>, vector<8x128xf32>
    tpu.vector_store %arg3[%c0_3, %c0_4], %2 {strides = array<i32>} : memref<8x128xf32, #tpu.memory_space<vmem>>, vector<8x128xf32>,
    return
  }
  func.func @transform_0(%arg0: i32) -> (i32, i32) {
    %c0_i32 = arith.constant 0 : i32
    %c0_i32_0 = arith.constant 0 : i32
    %c0_i32_1 = arith.constant 0 : i32
    return %c0_i32, %c0_i32_0 : i32, i32
  }
  func.func @transform_1(%arg0: i32) -> (i32, i32) {
    %c0_i32 = arith.constant 0 : i32
    %c0_i32_0 = arith.constant 0 : i32
    return %arg0, %c0_i32 : i32, i32
  }
  func.func @transform_2(%arg0: i32) -> (i32, i32) {
    %c0_i32 = arith.constant 0 : i32
    %c0_i32_0 = arith.constant 0 : i32
    return %arg0, %c0_i32 : i32, i32
  }
}

</mosaic_0001>

<bundles_post_ra>
// kernel: tpu_custom_call.1
= control target key start
LH: loop header
LB: loop body
LE: loop exit
PB: predicated region body
PF: predicated region fallthrough
CT: control target
= control target key end

     0   :  { %7 = vsyncpa [#allocation3], 0  ;;  %s318_s0 = inlined_call_operand.hbm [shape: f32[64,128], index: 0, kind: input, shape index: {}]   ;;  %s319_s1 = inlined_call_operand.hbm [shape: f32[8,64], index: 1, kind: input, shape index: {}]   ;;  %s320_s2 = inlined_call_operand.hbm [shape: f32[8,128], index: 2, kind: output, shape index: {}]  }
   0x1   :  { %8 = vsyncpa [#allocation6], 0 }
   0x2   :  { %9 = vsyncpa [#allocation4], 0  ;;  %s259_s9 = smov [#allocation2]   ;;  %s187_s13 = scalar_lea.hbm %s318_s0, 1024 }
   0x3   :  { %s15_s10 = sshll.u32 %s259_s9, 4  ;;  %p188_p0 = scmp.ne.s32.totalorder %s318_s0, %s187_s13  ;;  %s16_s10 = int_to_ptr.vmem [resolvable:$true] %s15_s10 }
   0x4   :  { %p191_p1 = scmp.lt.u32.totalorder %s187_s13, %s318_s0 }
   0x6   :  { %p193_p2 = pnand %p191_p1, %p188_p0 }
   0x8   :  { %196 = shalt.err (!%p193_p2)
}
   0x9   :  { %s197_s18 = scalar_lea.vmem %s16_s10, 1024  ;;  %p202_p4 = scmp.lt.s32.totalorder %s16_s10, %s16_s10 }
   0xa   :  { %p198_p3 = scmp.ne.s32.totalorder %s16_s10, %s197_s18  ;;  %p203_p5 = scmp.lt.s32.totalorder %s197_s18, %s197_s18 }
   0xc   :  { %p204_p6 = por %p203_p5, %p202_p4 }
   0xe   :  { %p205_p7 = pnand %p204_p6, %p198_p3 }
  0x10   :  { %208 = shalt.err (!%p205_p7)
}
  0x11   :  { %s260_s19 = smov 128   ;;  %s261_s20 = smov 8  }
  0x12   :  { %21 = dma.hbm_to_vmem [thread:$0]  %s318_s0, 1024, %s16_s10, [#allocation3], %s260_s19, %s260_s19, %s261_s20  }
  0x13   :  { %s262_s23 = smov [#allocation5]   ;;  %s209_s27 = scalar_lea.hbm %s319_s1, 128 }
  0x14   :  { %s28_s24 = sshll.u32 %s262_s23, 4  ;;  %p210_p8 = scmp.ne.s32.totalorder %s319_s1, %s209_s27  ;;  %s29_s24 = int_to_ptr.vmem [resolvable:$true] %s28_s24 }
  0x15   :  { %p213_p9 = scmp.lt.u32.totalorder %s209_s27, %s319_s1 }
  0x17   :  { %p215_p10 = pnand %p213_p9, %p210_p8 }
  0x19   :  { %218 = shalt.err (!%p215_p10)
}
  0x1a   :  { %s219_s4 = scalar_lea.vmem %s29_s24, 128  ;;  %p224_p12 = scmp.lt.s32.totalorder %s29_s24, %s29_s24 }
  0x1b   :  { %p220_p11 = scmp.ne.s32.totalorder %s29_s24, %s219_s4  ;;  %p225_p13 = scmp.lt.s32.totalorder %s219_s4, %s219_s4 }
  0x1d   :  { %p226_p0 = por %p225_p13, %p224_p12 }
  0x1f   :  { %p227_p1 = pnand %p226_p0, %p220_p11 }
  0x21   :  { %230 = shalt.err (!%p227_p1)
}
  0x22   :  { %31 = dma.hbm_to_vmem [thread:$0]  %s319_s1, 128, %s29_s24, [#allocation6]  }
  0x23   :  { %253 = dma.done.wait [#allocation3], 1024  }
  0x24   :  { %254 = vsyncadd [#allocation3], 4294966272 }
  0x25   :  { %255 = dma.done.wait [#allocation6], 128  }
  0x26   :  { %256 = vsyncadd [#allocation6], 4294967168  ;;  %v263_v0 = vmov 0.0|0.0   ;;  %vm264_vm0 = vmmov 0   ;;  %v265_v1 = vmov 0.0   ;;  %v39_v2 = vld [vmem:[#allocation2] sm:$0xff] }
  0x27   :  { %167 = vmatprep.subr.bf16.mxu0 %v263_v0  ;;  %164 = vmatprep.mubr.msk.f32.mxu0 %vm264_vm0, %v265_v1  ;;  %v40_v3 = vld [vmem:[#allocation2 + $0x8] sm:$0xff]  ;;  %v41_v4 = vld [vmem:[#allocation2 + $0x10] sm:$0xff]  ;;  %v42_v6 = vld [vmem:[#allocation2 + $0x18] sm:$0xff]  ;;  %vm47_vm1 = vcmask 523264   ;;  %s266_s1 = smov [#allocation7]  }
  0x28   :  { %v168_v5 = vpack.c.bf16 %v40_v3, %v39_v2  ;;  %v171_v7 = vpack.c.bf16 %v42_v6, %v41_v4  ;;  %v43_v8 = vld [vmem:[#allocation2 + $0x20] sm:$0xff]  ;;  %v44_v9 = vld [vmem:[#allocation2 + $0x28] sm:$0xff]  ;;  %v45_v11 = vld [vmem:[#allocation2 + $0x30] sm:$0xff]  ;;  %s128_s6 = sshll.u32 %s266_s1, 4  ;;  %s129_s6 = int_to_ptr.vmem [resolvable:$true] %s128_s6 }
  0x29   :  { %v174_v10 = vpack.c.bf16 %v44_v9, %v43_v8  ;;  %v46_v12 = vld [vmem:[#allocation2 + $0x38] sm:$0xff]  ;;  %v38_v14 = vld [vmem:[#allocation5] sm:$0xff]  ;;  %s231_s7 = scalar_lea.vmem %s129_s6, 128  ;;  %p236_p3 = scmp.lt.s32.totalorder %s129_s6, %s129_s6 }
  0x2a   :  { %169 = vmatpush3.bf16.msra.mxu0 %v168_v5  ;;  %v177_v13 = vpack.c.bf16 %v46_v12, %v45_v11  ;;  %p232_p2 = scmp.ne.s32.totalorder %s129_s6, %s231_s7  ;;  %p237_p4 = scmp.lt.s32.totalorder %s231_s7, %s231_s7 }
  0x2b   :  { %170 = vmatprep.subr.bf16.mxu0 %v263_v0 }
  0x2c   :  { %p238_p5 = por %p237_p4, %p236_p3 }
  0x2e   :  { %172 = vmatpush3.bf16.msra.mxu0 %v171_v7  ;;  %p239_p6 = pnand %p238_p5, %p232_p2 }
  0x2f   :  { %173 = vmatprep.subr.bf16.mxu0 %v263_v0 }
  0x32   :  { %175 = vmatpush3.bf16.msra.mxu0 %v174_v10 }
  0x33   :  { %176 = vmatprep.subr.bf16.mxu0 %v263_v0 }
  0x36   :  { %178 = vmatpush3.bf16.msra.mxu0 %v177_v13 }
  0x39   :  { %165 = vmatmul.mubr.msk.f32.vlgmr.msra.gmra.mrb[0].mxu0 %vm47_vm1, %v38_v14 }
 0x10c   :  { %v117_v15 = vpop.f32.mrb[0].mxu0 }
 0x10d   :  { %121 = vst [vmem:[#allocation7] sm:$0xff] %v117_v15  ;;  %v166_v16 = vpop.f32.mrb[1].mxu0 }
 0x10e   :  { %242 = shalt.err (!%p239_p6)
}
 0x10f   :  { %s243_s10 = scalar_lea.hbm %s320_s2, 128 }
 0x110   :  { %p244_p7 = scmp.ne.s32.totalorder %s320_s2, %s243_s10  ;;  %p247_p8 = scmp.lt.u32.totalorder %s243_s10, %s320_s2 }
 0x112   :  { %p249_p9 = pnand %p247_p8, %p244_p7 }
 0x114   :  { %252 = shalt.err (!%p249_p9)
}
 0x115   :  { %131 = dma.vmem_to_hbm [thread:$0]  %s129_s6, 128, %s320_s2, [#allocation4]  }
 0x116   :  { %257 = dma.done.wait [#allocation4], 128  }
 0x117   :  { %258 = vsyncadd [#allocation4], 4294967168 }
 0x118   :  { %135 = vsyncpa [#allocation3], 1 }
 0x119   :  { %136 = vsyncpa [#allocation6], 1 }
 0x11a   :  { %137 = vsyncpa [#allocation4], 1 }

</bundles_post_ra>
